<compile_context>
chip_gen: v6e
topology: v6e:2x2x1
jax: 0.10.0
libtpu: 0.0.40
codegen_flags: <defaults>
</compile_context>

<pallas_src>
import functools

import jax
import jax.numpy as jnp
from jax.experimental import pallas as pl
from jax.experimental.pallas import tpu as pltpu

_LANE = 128
_SUBLANE = 8
# VMEM devoted to the two pipelined inputs (x2 double buffers each).  16 MiB
# keeps 2x headroom under the 32 MiB scoped limit requested below and fits
# every TPU generation (v7x physical VMEM is 64 MiB).
_INPUT_VMEM_BUDGET = 16 * 1024 * 1024


def _jaccard_kernel(x_ref, t_ref, loss_ref, inter_acc, tsum_acc, *, n_pixels):
    # x_ref / t_ref: (C, TR, 128) VMEM slab — one spatial tile of one sample.
    s_id = pl.program_id(1)

    @pl.when(s_id == 0)
    def _():
        inter_acc[...] = jnp.zeros_like(inter_acc)
        tsum_acc[...] = jnp.zeros_like(tsum_acc)

    x = x_ref[...].astype(jnp.float32)
    t = t_ref[...].astype(jnp.float32)

    # Channel-axis (axis 0) softmax pieces without forming the softmax itself.
    m = jnp.max(x, axis=0, keepdims=True)        # (1, TR, 128)
    e = jnp.exp(x - m)                           # (C, TR, 128)   EUP
    den = jnp.sum(e, axis=0)                     # (TR, 128)
    num = jnp.sum(e * t, axis=0)                 # (TR, 128)

    # softmax·target per pixel: EUP vrcp seed + one Newton step (~f32 exact).
    r = pl.reciprocal(den, approx=True)
    r = r * (2.0 - den * r)
    pixel = num * r                              # (TR, 128)

    # Per-lane partial sums; cross-lane reduce deferred to the last tile.
    inter_acc[...] += jnp.sum(pixel, axis=0, keepdims=True)               # (1,128)
    tsum_acc[...] += jnp.sum(jnp.sum(t, axis=0), axis=0, keepdims=True)   # (1,128)

    @pl.when(s_id == pl.num_programs(1) - 1)
    def _():
        inter = jnp.sum(inter_acc[...], axis=1, keepdims=True)   # (1, 1)
        tsum = jnp.sum(tsum_acc[...], axis=1, keepdims=True)     # (1, 1)
        # sum_C softmax == 1 per pixel  ->  sum(softmax) over sample == H*W.
        union = (n_pixels + tsum) - inter
        loss_ref[...] = jnp.broadcast_to(1.0 - inter / union, loss_ref.shape)


def _choose_row_tile(r0, c, itemsize):
    """Number of 128-lane rows per spatial tile (multiple of 8 or full extent)."""
    cap = _INPUT_VMEM_BUDGET // (4 * c * _LANE * itemsize)  # 2 inputs x 2 bufs
    cap = max(_SUBLANE, (cap // _SUBLANE) * _SUBLANE)
    if r0 <= cap:
        return r0                          # single tile; block == full extent
    for tr in range(cap, _SUBLANE - 1, -_SUBLANE):
        if r0 % tr == 0:                   # exact divisor -> no row padding
            return tr
    return cap                             # fall back: pad rows to a multiple


def jaccard_loss(inputs, targets):
    """Soft Jaccard loss matching torch JaccardLoss.forward (NCHW inputs)."""
    N, C, H, W = inputs.shape
    n_pixels = H * W
    itemsize = jnp.dtype(inputs.dtype).itemsize

    r0 = pl.cdiv(n_pixels, _LANE)                 # 128-lane rows needed
    tr = _choose_row_tile(r0, C, itemsize)
    rows = pl.cdiv(r0, tr) * tr                   # padded row count
    s_pad = rows * _LANE
    num_tiles = rows // tr

    def to_slabs(a):
        a = a.reshape(N, C, n_pixels)
        if s_pad != n_pixels:
            # Zero padding is exact: padded targets contribute nothing to the
            # intersection or to sum(t); softmax of padded zeros is finite.
            a = jnp.pad(a, ((0, 0), (0, 0), (0, s_pad - n_pixels)))
        return a.reshape(N, C, rows, _LANE)

    x = to_slabs(inputs)
    t = to_slabs(targets)

    kernel = functools.partial(_jaccard_kernel, n_pixels=float(n_pixels))

    per_sample = pl.pallas_call(
        kernel,
        out_shape=jax.ShapeDtypeStruct((N, _SUBLANE, _LANE), jnp.float32),
        grid=(N, num_tiles),
        in_specs=[
            pl.BlockSpec((None, C, tr, _LANE), lambda b, s: (b, 0, s, 0)),
            pl.BlockSpec((None, C, tr, _LANE), lambda b, s: (b, 0, s, 0)),
        ],
        out_specs=pl.BlockSpec((None, _SUBLANE, _LANE), lambda b, s: (b, 0, 0)),
        scratch_shapes=[
            pltpu.VMEM((1, _LANE), jnp.float32),   # running per-lane intersection
            pltpu.VMEM((1, _LANE), jnp.float32),   # running per-lane sum(targets)
        ],
        compiler_params=pltpu.CompilerParams(
            dimension_semantics=("parallel", "arbitrary"),
            vmem_limit_bytes=32 * 1024 * 1024,
        ),
    )(x, t)

    # Final mean over the batch (plain-JAX glue on N scalars).
    return jnp.mean(per_sample[:, 0, 0])


def _jaccard_loss_ref(inputs, targets):
    s = jax.nn.softmax(inputs, axis=1)
    intersection = jnp.sum(s * targets, axis=(1, 2, 3))
    union = jnp.sum(s + targets, axis=(1, 2, 3)) - intersection
    return jnp.mean(1.0 - intersection / union)


if __name__ == "__main__":
    key = jax.random.PRNGKey(0)
    k1, k2, k3, k4 = jax.random.split(key, 4)

    # Case 1: small NCHW shape consistent with the module.
    N, C, H, W = 2, 4, 16, 16
    inputs = jax.random.normal(k1, (N, C, H, W), dtype=jnp.float32)
    labels = jax.random.randint(k2, (N, H, W), 0, C)
    targets = jax.nn.one_hot(labels, C, axis=1, dtype=jnp.float32)

    out = jax.block_until_ready(jaccard_loss(inputs, targets))
    ref = _jaccard_loss_ref(inputs, targets)
    assert jnp.allclose(out, ref, atol=1e-4, rtol=1e-4), (out, ref)

    # Case 2: spatial size not a multiple of 128 (exercises lane padding).
    N2, C2, H2, W2 = 2, 3, 20, 20
    inputs2 = jax.random.normal(k3, (N2, C2, H2, W2), dtype=jnp.float32)
    labels2 = jax.random.randint(k4, (N2, H2, W2), 0, C2)
    targets2 = jax.nn.one_hot(labels2, C2, axis=1, dtype=jnp.float32)

    out2 = jax.block_until_ready(jaccard_loss(inputs2, targets2))
    ref2 = _jaccard_loss_ref(inputs2, targets2)
    assert jnp.allclose(out2, ref2, atol=1e-4, rtol=1e-4), (out2, ref2)

    print("KERNEL_OK")
</pallas_src>

<mosaic_0001>
module attributes {stable_mosaic.version = 11 : i64} {
  func.func @_jaccard_kernel(%arg0: i32, %arg1: i32, %arg2: memref<1x4x2x128xf32, #tpu.memory_space<vmem>>, %arg3: memref<1x4x2x128xf32, #tpu.memory_space<vmem>>, %arg4: memref<1x8x128xf32, #tpu.memory_space<vmem>>, %arg5: memref<1x128xf32, #tpu.memory_space<vmem>>, %arg6: memref<1x128xf32, #tpu.memory_space<vmem>>) attributes {dimension_semantics = [#tpu.dimension_semantics<parallel>, #tpu.dimension_semantics<arbitrary>], iteration_bounds = array<i64: 2, 1>, scalar_prefetch = 0 : i64, scratch_operands = 2 : i64, tpu.core_type = #tpu.core_type<tc>, window_params = [{transform_indices = @transform_0, window_bounds = array<i64: 1, 4, 2, 128>}, {transform_indices = @transform_1, window_bounds = array<i64: 1, 4, 2, 128>}, {transform_indices = @transform_2, window_bounds = array<i64: 1, 8, 128>}]} {
    %c0_i32 = arith.constant 0 : i32
    %0 = arith.cmpi eq, %arg1, %c0_i32 : i32
    %1 = arith.extui %0 : i1 to i32
    %c0_i32_0 = arith.constant 0 : i32
    %2 = arith.cmpi ne, %1, %c0_i32_0 : i32
    scf.if %2 {
      %cst_24 = arith.constant 0.000000e+00 : f32
      %35 = vector.broadcast %cst_24 : f32 to vector<1x128xf32>
      %c0_25 = arith.constant 0 : index
      %c0_26 = arith.constant 0 : index
      %36 = vector.load %arg5[%c0_25, %c0_26] : memref<1x128xf32, #tpu.memory_space<vmem>>, vector<1x128xf32>
      tpu.vector_store %arg5[%c0_25, %c0_26], %35 {strides = array<i32>} : memref<1x128xf32, #tpu.memory_space<vmem>>, vector<1x128xf32>,
      %cst_27 = arith.constant 0.000000e+00 : f32
      %37 = vector.broadcast %cst_27 : f32 to vector<1x128xf32>
      %c0_28 = arith.constant 0 : index
      %c0_29 = arith.constant 0 : index
      %38 = vector.load %arg6[%c0_28, %c0_29] : memref<1x128xf32, #tpu.memory_space<vmem>>, vector<1x128xf32>
      tpu.vector_store %arg6[%c0_28, %c0_29], %37 {strides = array<i32>} : memref<1x128xf32, #tpu.memory_space<vmem>>, vector<1x128xf32>,
    } else {
    }
    %c0 = arith.constant 0 : index
    %c0_1 = arith.constant 0 : index
    %c0_2 = arith.constant 0 : index
    %c0_3 = arith.constant 0 : index
    %3 = vector.load %arg2[%c0, %c0_1, %c0_2, %c0_3] : memref<1x4x2x128xf32, #tpu.memory_space<vmem>>, vector<1x4x2x128xf32>
    %4 = vector.shape_cast %3 : vector<1x4x2x128xf32> to vector<4x2x128xf32>
    %c0_4 = arith.constant 0 : index
    %c0_5 = arith.constant 0 : index
    %c0_6 = arith.constant 0 : index
    %c0_7 = arith.constant 0 : index
    %5 = vector.load %arg3[%c0_4, %c0_5, %c0_6, %c0_7] : memref<1x4x2x128xf32, #tpu.memory_space<vmem>>, vector<1x4x2x128xf32>
    %6 = vector.shape_cast %5 : vector<1x4x2x128xf32> to vector<4x2x128xf32>
    %cst = arith.constant dense<0xFF800000> : vector<2x128xf32>
    %7 = vector.multi_reduction <maximumf>, %4, %cst [0] : vector<4x2x128xf32> to vector<2x128xf32>
    %8 = vector.shape_cast %7 : vector<2x128xf32> to vector<1x2x128xf32>
    %9 = vector.broadcast %8 : vector<1x2x128xf32> to vector<4x2x128xf32>
    %10 = arith.subf %4, %9 : vector<4x2x128xf32>
    %11 = math.exp %10 : vector<4x2x128xf32>
    %cst_8 = arith.constant dense<0.000000e+00> : vector<2x128xf32>
    %12 = vector.multi_reduction <add>, %11, %cst_8 [0] : vector<4x2x128xf32> to vector<2x128xf32>
    %13 = arith.mulf %11, %6 : vector<4x2x128xf32>
    %cst_9 = arith.constant dense<0.000000e+00> : vector<2x128xf32>
    %14 = vector.multi_reduction <add>, %13, %cst_9 [0] : vector<4x2x128xf32> to vector<2x128xf32>
    %15 = tpu.reciprocal %12 {approx = true} : vector<2x128xf32> -> vector<2x128xf32>
    %16 = arith.mulf %12, %15 : vector<2x128xf32>
    %cst_10 = arith.constant 2.000000e+00 : f32
    %17 = vector.broadcast %cst_10 : f32 to vector<2x128xf32>
    %18 = arith.subf %17, %16 : vector<2x128xf32>
    %19 = arith.mulf %15, %18 : vector<2x128xf32>
    %20 = arith.mulf %14, %19 : vector<2x128xf32>
    %c0_11 = arith.constant 0 : index
    %c0_12 = arith.constant 0 : index
    %21 = vector.load %arg5[%c0_11, %c0_12] : memref<1x128xf32, #tpu.memory_space<vmem>>, vector<1x128xf32>
    %cst_13 = arith.constant dense<0.000000e+00> : vector<128xf32>
    %22 = vector.multi_reduction <add>, %20, %cst_13 [0] : vector<2x128xf32> to vector<128xf32>
    %23 = vector.shape_cast %22 : vector<128xf32> to vector<1x128xf32>
    %24 = arith.addf %21, %23 : vector<1x128xf32>
    %c0_14 = arith.constant 0 : index
    %c0_15 = arith.constant 0 : index
    %25 = vector.load %arg5[%c0_14, %c0_15] : memref<1x128xf32, #tpu.memory_space<vmem>>, vector<1x128xf32>
    tpu.vector_store %arg5[%c0_14, %c0_15], %24 {strides = array<i32>} : memref<1x128xf32, #tpu.memory_space<vmem>>, vector<1x128xf32>,
    %c0_16 = arith.constant 0 : index
    %c0_17 = arith.constant 0 : index
    %26 = vector.load %arg6[%c0_16, %c0_17] : memref<1x128xf32, #tpu.memory_space<vmem>>, vector<1x128xf32>
    %cst_18 = arith.constant dense<0.000000e+00> : vector<2x128xf32>
    %27 = vector.multi_reduction <add>, %6, %cst_18 [0] : vector<4x2x128xf32> to vector<2x128xf32>
    %cst_19 = arith.constant dense<0.000000e+00> : vector<128xf32>
    %28 = vector.multi_reduction <add>, %27, %cst_19 [0] : vector<2x128xf32> to vector<128xf32>
    %29 = vector.shape_cast %28 : vector<128xf32> to vector<1x128xf32>
    %30 = arith.addf %26, %29 : vector<1x128xf32>
    %c0_20 = arith.constant 0 : index
    %c0_21 = arith.constant 0 : index
    %31 = vector.load %arg6[%c0_20, %c0_21] : memref<1x128xf32, #tpu.memory_space<vmem>>, vector<1x128xf32>
    tpu.vector_store %arg6[%c0_20, %c0_21], %30 {strides = array<i32>} : memref<1x128xf32, #tpu.memory_space<vmem>>, vector<1x128xf32>,
    %c0_i32_22 = arith.constant 0 : i32
    %32 = arith.cmpi eq, %arg1, %c0_i32_22 : i32
    %33 = arith.extui %32 : i1 to i32
    %c0_i32_23 = arith.constant 0 : i32
    %34 = arith.cmpi ne, %33, %c0_i32_23 : i32
    scf.if %34 {
      %c0_24 = arith.constant 0 : index
      %c0_25 = arith.constant 0 : index
      %35 = vector.load %arg5[%c0_24, %c0_25] : memref<1x128xf32, #tpu.memory_space<vmem>>, vector<1x128xf32>
      %cst_26 = arith.constant dense<0.000000e+00> : vector<1xf32>
      %36 = vector.multi_reduction <add>, %35, %cst_26 [1] : vector<1x128xf32> to vector<1xf32>
      %37 = vector.shape_cast %36 : vector<1xf32> to vector<1x1xf32>
      %c0_27 = arith.constant 0 : index
      %c0_28 = arith.constant 0 : index
      %38 = vector.load %arg6[%c0_27, %c0_28] : memref<1x128xf32, #tpu.memory_space<vmem>>, vector<1x128xf32>
      %cst_29 = arith.constant dense<0.000000e+00> : vector<1xf32>
      %39 = vector.multi_reduction <add>, %38, %cst_29 [1] : vector<1x128xf32> to vector<1xf32>
      %40 = vector.shape_cast %39 : vector<1xf32> to vector<1x1xf32>
      %cst_30 = arith.constant 2.560000e+02 : f32
      %41 = vector.broadcast %cst_30 : f32 to vector<1x1xf32>
      %42 = arith.addf %41, %40 : vector<1x1xf32>
      %43 = arith.subf %42, %37 : vector<1x1xf32>
      %44 = arith.divf %37, %43 : vector<1x1xf32>
      %cst_31 = arith.constant 1.000000e+00 : f32
      %45 = vector.broadcast %cst_31 : f32 to vector<1x1xf32>
      %46 = arith.subf %45, %44 : vector<1x1xf32>
      %47 = vector.shape_cast %46 : vector<1x1xf32> to vector<1x1xf32>
      %48 = vector.broadcast %47 : vector<1x1xf32> to vector<8x128xf32>
      %c0_32 = arith.constant 0 : index
      %c0_33 = arith.constant 0 : index
      %c0_34 = arith.constant 0 : index
      %49 = vector.load %arg4[%c0_32, %c0_33, %c0_34] : memref<1x8x128xf32, #tpu.memory_space<vmem>>, vector<1x8x128xf32>
      %50 = vector.shape_cast %49 : vector<1x8x128xf32> to vector<8x128xf32>
      %51 = vector.shape_cast %48 : vector<8x128xf32> to vector<1x8x128xf32>
      tpu.vector_store %arg4[%c0_32, %c0_33, %c0_34], %51 {strides = array<i32>} : memref<1x8x128xf32, #tpu.memory_space<vmem>>, vector<1x8x128xf32>,
    } else {
    }
    return
  }
  func.func @transform_0(%arg0: i32, %arg1: i32) -> (i32, i32, i32, i32) {
    %c0_i32 = arith.constant 0 : i32
    %c0_i32_0 = arith.constant 0 : i32
    %c0_i32_1 = arith.constant 0 : i32
    return %arg0, %c0_i32, %arg1, %c0_i32_0 : i32, i32, i32, i32
  }
  func.func @transform_1(%arg0: i32, %arg1: i32) -> (i32, i32, i32, i32) {
    %c0_i32 = arith.constant 0 : i32
    %c0_i32_0 = arith.constant 0 : i32
    %c0_i32_1 = arith.constant 0 : i32
    return %arg0, %c0_i32, %arg1, %c0_i32_0 : i32, i32, i32, i32
  }
  func.func @transform_2(%arg0: i32, %arg1: i32) -> (i32, i32, i32) {
    %c0_i32 = arith.constant 0 : i32
    %c0_i32_0 = arith.constant 0 : i32
    %c0_i32_1 = arith.constant 0 : i32
    return %arg0, %c0_i32, %c0_i32_0 : i32, i32, i32
  }
}

</mosaic_0001>

<bundles_post_ra>
// kernel: tpu_custom_call.1
= control target key start
LH: loop header
LB: loop body
LE: loop exit
PB: predicated region body
PF: predicated region fallthrough
CT: control target
= control target key end

     0   :  { %7 = vsyncpa [#allocation5], 0  ;;  %s902_s0 = inlined_call_operand.hbm [shape: f32[2,4,2,128], index: 0, kind: input, shape index: {}]   ;;  %s903_s1 = inlined_call_operand.hbm [shape: f32[2,4,2,128], index: 1, kind: input, shape index: {}]   ;;  %s904_s2 = inlined_call_operand.hbm [shape: f32[2,8,128], index: 2, kind: output, shape index: {}]  }
   0x1   :  { %9 = vsyncpa [#allocation5 + $0x1], 0 }
   0x2   :  { %10 = vsyncpa [#allocation8], 0 }
   0x3   :  { %12 = vsyncpa [#allocation8 + $0x1], 0 }
   0x4   :  { %13 = vsyncpa [#allocation6], 0 }
   0x5   :  { %15 = vsyncpa [#allocation6 + $0x1], 0  ;;  %s710_s9 = smov 0   ;;  %s712_s10 = smov 0  }
   0x6   :  { %s714_s11 = smov 0   ;;  %s716_s12 = smov 0  }
   0x7   :  { %s718_s13 = smov 0   ;;  %s720_s14 = smov 0  }
   0x8 LB: > { %s445_s15 = sadd.s32 4294967295, %s687_s14   ;;  %s446_s16 = sadd.s32 4294967294, %s687_s14   ;;  %s687_s14 = sphi %s720_s14, %s21_s14   ;;  %s683_s13 = sphi %s718_s13, %s916_s13   ;;  %s679_s12 = sphi %s716_s12, %s915_s12   ;;  %s675_s11 = sphi %s714_s11, %s914_s11   ;;  %s671_s10 = sphi %s712_s10, %s913_s10   ;;  %s667_s9 = sphi %s710_s9, %s912_s9  }
   0x9   : > { %s33_s17 = sadd.s32 1, %s683_s13  ;;  %s42_s18 = sadd.s32 1, %s675_s11 }
   0xa   : > { %p35_p0 = scmp.ge.s32.totalorder %s33_s17, 2  ;;  %p49_p1 = scmp.ne.s32.totalorder %s675_s11, %s671_s10 }
   0xb   : > { %p50_p2 = scmp.eq.s32.totalorder %s687_s14, 0  ;;  %p55_p3 = scmp.ne.s32.totalorder %s671_s10, %s667_s9 }
   0xc   : > { %s918_s17 = smov (%p35_p0, %s33_s17), 0  ;;  %p56_p5 = scmp.eq.s32.totalorder %s445_s15, 0 }
   0xd   : > { %p751_p4 = por %p50_p2, %p49_p1  ;;  %s37_s20 = ssub.s32 %s683_s13, %s918_s17 }
   0xe   : > { %p107_p6 = scmp.eq.s32.totalorder %s445_s15, 1  ;;  %p40_p7 = scmp.eq.s32.totalorder %s37_s20, 0 }
   0xf   : > { %p757_p8 = por %p56_p5, %p55_p3  ;;  %p113_p10 = scmp.eq.s32.totalorder %s446_s16, 1 }
  0x10   : > { %p761_p9 = por %p107_p6, %p49_p1  ;;  %p482_p13 = scmp.lt.s32.totalorder %s687_s14, 2 }
  0x11   : > { %s766_s23 = scalar_select %p40_p7, %s675_s11, %s42_s18  }
  0x12   : > { %p768_p11 = por %p113_p10, %p55_p3  ;;  %s775_s25 = sand.u32 1, %s675_s11  }
  0x13   : > { %s449_s26 = sshll.u32 %s775_s25, 3  ;;  %s463_s27 = sshll.u32 %s683_s13, 7 }
  0x14   : > { %s144_s30 = scalar_lea.hbm %s902_s0, %s463_s27  ;;  %s137_s3 = scalar_lea.vmem [#allocation4], %s449_s26 }
  0x15   : > { %s145_s4 = sshll.u32 %s137_s3, 4  ;;  %p788_p0 = pnand %p482_p13, %p751_p4  ;;  %s146_s4 = int_to_ptr.vmem [resolvable:$true] %s145_s4 }
  0x16   : > { %p455_p1 = scmp.ge.s32.totalorder %s687_s14, 1  ;;  %s134_s6 = scalar_lea.sflag [#allocation5], %s775_s25 }
  0x17   : > { %p549_p2 = pneg %p788_p0  ;;  %s560_s7 = scalar_lea.vmem %s146_s4, 128 }
  0x18   : > { %p561_p3 = scmp.ne.s32.totalorder %s146_s4, %s560_s7  ;;  %s689_s8 = smov [#allocation4]  }
  0x19   : > { %s565_s15 = sshll.u32 %s689_s8, 4  ;;  %s566_s15 = int_to_ptr.vmem [resolvable:$false] %s565_s15 }
  0x1a   : > { %p563_p5 = pnand %p561_p3, %p549_p2  ;;  %s567_s16 = scalar_lea.vmem %s566_s15, 256 }
  0x1b   : > { %p568_p4 = scmp.lt.s32.totalorder %s146_s4, %s566_s15  ;;  %p569_p7 = scmp.lt.s32.totalorder %s567_s16, %s560_s7 }
  0x1c   : > { %p564_p6 = pneg %p563_p5 }
  0x1d   : > { %p570_p10 = por %p569_p7, %p568_p4 }
  0x1f   : > { %p571_p13 = pnand %p570_p10, %p564_p6 }
  0x21   : > { %574 = shalt.err (!%p571_p13)
}
  0x22   : > { %s690_s18 = smov 32   ;;  %s691_s19 = smov 2  }
  0x23   : > { %474 = dma.hbm_to_vmem [thread:$0]  (!%p788_p0), %s144_s30, 128, %s146_s4, %s134_s6, %s690_s18, %s690_s18, %s691_s19  }
  0x24   : > { %p175_p3 = scmp.lt.s32.totalorder %s687_s14, 3  ;;  %s166_s29 = scalar_lea.hbm %s903_s1, %s463_s27 }
  0x25   : > { %s159_s7 = scalar_lea.vmem [#allocation7], %s449_s26  ;;  %s156_s15 = scalar_lea.sflag [#allocation8], %s775_s25 }
  0x26   : > { %p809_p5 = pnand %p455_p1, %p175_p3  ;;  %s167_s8 = sshll.u32 %s159_s7, 4  ;;  %s168_s8 = int_to_ptr.vmem [resolvable:$true] %s167_s8 }
  0x27   : > { %s588_s16 = scalar_lea.vmem %s168_s8, 128  ;;  %s692_s30 = smov [#allocation7]  }
  0x28   : > { %p589_p6 = scmp.ne.s32.totalorder %s168_s8, %s588_s16  ;;  %s593_s4 = sshll.u32 %s692_s30, 4  ;;  %s594_s4 = int_to_ptr.vmem [resolvable:$false] %s593_s4 }
  0x29   : > { %s595_s27 = scalar_lea.vmem %s594_s4, 256  ;;  %p596_p10 = scmp.lt.s32.totalorder %s168_s8, %s594_s4 }
  0x2a   : > { %p591_p4 = pnand %p589_p6, %p549_p2  ;;  %p597_p1 = scmp.lt.s32.totalorder %s595_s27, %s588_s16 }
  0x2c   : > { %p592_p7 = pneg %p591_p4  ;;  %p598_p13 = por %p597_p1, %p596_p10 }
  0x2e   : > { %p599_p3 = pnand %p598_p13, %p592_p7 }
  0x30   : > { %602 = shalt.err (!%p599_p3)
}
  0x31   : > { %477 = dma.hbm_to_vmem [thread:$0]  (!%p788_p0), %s166_s29, 128, %s168_s8, %s156_s15, %s690_s18, %s690_s18, %s691_s19  }
  0x32   : > { %179 = sbr.rel (%p809_p5) target bundleno = 312 (0x138), region = 28  ;;  %s824_s25 = sand.u32 (!%p809_p5), 1, %s671_s10  }
  0x33   : > { %s827_s26 = sshll.u32 (!%p809_p5), %s824_s25, 3  ;;  %s182_s6 = scalar_lea.sflag (!%p809_p5), [#allocation5], %s824_s25 }
  0x34   : > { %s185_s20 = scalar_lea.vmem (!%p809_p5), [#allocation4], %s827_s26 }
  0x37   : > { %654 = dma.done.wait (%p757_p8), %s182_s6, 128  }
  0x38   : > { %656 = vsyncadd (%p757_p8), %s182_s6, 4294967168  ;;  %s191_s5 = scalar_lea.sflag [#allocation8], %s824_s25  ;;  %s194_s18 = scalar_lea.vmem [#allocation7], %s827_s26 }
  0x39   : > { %658 = dma.done.wait (%p757_p8), %s191_s5, 128  }
  0x3a   : > { %660 = vsyncadd (%p757_p8), %s191_s5, 4294967168  ;;  %v693_v0 = vmov 0.0   ;;  %vm234_vm0 = vcmask 1041408   ;;  %v226_v1 = vld [vmem:[%s185_s20] sm:$0x3]  ;;  %vm308_vm1 = vcmask 1040384  }
  0x3b   : > { %225 = vst [vmem:[#allocation3] sm:$0x1] %v693_v0  ;;  %224 = vst [vmem:[#allocation2] sm:$0x1] %v693_v0  ;;  %v227_v2 = vld [vmem:[%s185_s20 + $0x2] sm:$0x3] }
  0x3c   : > { %v228_v3 = vld [vmem:[%s185_s20 + $0x4] sm:$0x3]  ;;  %v229_v4 = vld [vmem:[%s185_s20 + $0x6] sm:$0x3]  ;;  %v230_v5 = vld [vmem:[%s194_s18] sm:$0x3] }
  0x3d   : > { %v231_v6 = vld [vmem:[%s194_s18 + $0x2] sm:$0x3]  ;;  %v232_v7 = vld [vmem:[%s194_s18 + $0x4] sm:$0x3]  ;;  %v235_v8 = vsel %vm234_vm0, %v226_v1, -inf  ;;  %v236_v9 = vsel %vm234_vm0, %v227_v2, -inf }
  0x3e   : > { %v233_v10 = vld [vmem:[%s194_s18 + $0x6] sm:$0x3]  ;;  %v237_v11 = vsel %vm234_vm0, %v228_v3, -inf  ;;  %v238_v12 = vsel %vm234_vm0, %v229_v4, -inf  ;;  %v239_v13 = vmax.f32 %v235_v8, %v236_v9  ;;  %v288_v14 = vsel %vm234_vm0, %v230_v5, 0.0  ;;  %s460_s21 = sshll.u32 %s679_s12, 7 }
  0x3f   : > { %v240_v15 = vmax.f32 %v237_v11, %v238_v12  ;;  %v289_v16 = vsel %vm234_vm0, %v231_v6, 0.0  ;;  %v291_v17 = vsel %vm234_vm0, %v232_v7, 0.0  ;;  %v293_v20 = vsel %vm234_vm0, %v233_v10, 0.0  ;;  %s219_s19 = scalar_lea.vmem [#allocation9], %s827_s26  ;;  %s338_s7 = scalar_lea.hbm %s904_s2, %s460_s21 }
  0x40   : > { %v290_v18 = vadd.f32 %v289_v16, %v288_v14  ;;  %s340_s28 = sshll.u32 %s219_s19, 4  ;;  %s327_s8 = scalar_lea.sflag [#allocation6], %s824_s25  ;;  %s341_s28 = int_to_ptr.vmem [resolvable:$true] %s340_s28 }
  0x41   : > { %v241_v19 = vmax.f32 %v239_v13, %v240_v15  ;;  %s603_s15 = scalar_lea.vmem %s341_s28, 128  ;;  %s694_s16 = smov [#allocation9]  }
  0x42   : > { %v292_v21 = vadd.f32 %v291_v17, %v290_v18  ;;  %v287_v37 = vld [vmem:[#allocation3] sm:$0x1]  ;;  %v277_v12 = vld [vmem:[#allocation2] sm:$0x1]  ;;  %p604_p8 = scmp.ne.s32.totalorder %s341_s28, %s603_s15  ;;  %s607_s30 = sshll.u32 %s694_s16, 4  ;;  %s608_s30 = int_to_ptr.vmem [resolvable:$false] %s607_s30 }
  0x43   : > { %v242_v22 = vsub.f32 %v226_v1, %v241_v19  ;;  %v243_v23 = vsub.f32 %v227_v2, %v241_v19  ;;  %v244_v24 = vsub.f32 %v228_v3, %v241_v19  ;;  %v245_v25 = vsub.f32 %v229_v4, %v241_v19  ;;  %s609_s12 = scalar_lea.vmem %s608_s30, 256  ;;  %p610_p5 = scmp.lt.s32.totalorder %s341_s28, %s608_s30 }
  0x44   : > { %v294_v26 = vadd.f32 %v293_v20, %v292_v21  ;;  %v321_v20 = vlaneseq  ;;  %p605_p0 = pnand %p604_p8, %p761_p9  ;;  %p611_p6 = scmp.lt.s32.totalorder %s609_s12, %s603_s15 }
  0x45   : > { %v246_v27 = vmul.f32 1.442695, %v242_v22  ;;  %v248_v28 = vmul.f32 1.442695, %v243_v23  ;;  %v250_v29 = vmul.f32 1.442695, %v244_v24 }
  0x46   : > { %v252_v30 = vmul.f32 1.442695, %v245_v25  ;;  %v295_v31 = vsel %vm234_vm0, %v294_v26, 0.0  ;;  %v322_v21 = vshrl.u32 %v321_v20, 7  ;;  %p606_p2 = pneg %p605_p0  ;;  %p612_p4 = por %p611_p6, %p610_p5 }
  0x47   : > { %535 = vpow2.f32 %v246_v27  ;;  %v296_v32 = vrot.slane %v295_v31, 4 }
  0x48   : > { %537 = vpow2.f32 %v248_v28  ;;  %v323_v23 = vsub.s32 0, %v322_v21  ;;  %p613_p7 = pnand %p612_p4, %p606_p2 }
  0x49   : > { %539 = vpow2.f32 %v250_v29  ;;  %v297_v33 = vadd.f32 %v296_v32, %v295_v31 }
  0x4a   : > { %541 = vpow2.f32 %v252_v30 }
  0x4b   : > { %v298_v34 = vrot.slane %v297_v33, 2 }
  0x4d   : > { %v299_v35 = vadd.f32 %v298_v34, %v297_v33 }
  0x4f   : > { %v300_v36 = vrot.slane %v299_v35, 1 }
  0x51   : > { %v301_v38 = vadd.f32 %v300_v36, %v299_v35 }
  0x53   : > { %v302_v39 = vadd.f32 %v301_v38, %v287_v37 }
  0x54   : > { %v536_v40 = vpop.eup %535 }
  0x55   : > { %v538_v41 = vpop.eup %537  ;;  %303 = vst [vmem:[#allocation3] sm:$0x1] %v302_v39  ;;  %v254_v42 = vsel %vm234_vm0, %v536_v40, 0.0  ;;  %v261_v53 = vmul.f32 %v536_v40, %v230_v5 }
  0x56   : > { %v540_v43 = vpop.eup %539  ;;  %v255_v44 = vsel %vm234_vm0, %v538_v41, 0.0  ;;  %v262_v54 = vmul.f32 %v538_v41, %v231_v6 }
  0x57   : > { %v542_v45 = vpop.eup %541  ;;  %v256_v46 = vadd.f32 %v255_v44, %v254_v42  ;;  %v257_v47 = vsel %vm234_vm0, %v540_v43, 0.0  ;;  %v263_v55 = vmul.f32 %v540_v43, %v232_v7  ;;  %v265_v56 = vsel %vm234_vm0, %v261_v53, 0.0 }
  0x58   : > { %v259_v48 = vsel %vm234_vm0, %v542_v45, 0.0  ;;  %v266_v57 = vsel %vm234_vm0, %v262_v54, 0.0  ;;  %v264_v59 = vmul.f32 %v542_v45, %v233_v10 }
  0x59   : > { %v258_v49 = vadd.f32 %v257_v47, %v256_v46  ;;  %v267_v58 = vadd.f32 %v266_v57, %v265_v56  ;;  %v268_v60 = vsel %vm234_vm0, %v263_v55, 0.0 }
  0x5a   : > { %v270_v63 = vsel %vm234_vm0, %v264_v59, 0.0 }
  0x5b   : > { %v260_v50 = vadd.f32 %v259_v48, %v258_v49  ;;  %v269_v61 = vadd.f32 %v268_v60, %v267_v58 }
  0x5c   : > { %v312_v51 = vld [vmem:[#allocation3] sm:$0x1] }
  0x5d   : > { %v313_v52 = vsel %vm308_vm1, %v312_v51, 0.0  ;;  %543 = vrcp.f32 %v260_v50  ;;  %v271_v1 = vadd.f32 %v270_v63, %v269_v61 }
  0x5e   : > { %314 = vadd.xlane.f32.xlu0 %v313_v52 }
  0x6a   : > { %v544_v62 = vpop.eup %543 }
  0x6b   : > { %v273_v0 = vmul.f32 %v544_v62, %v260_v50 }
  0x6d   : > { %v274_v2 = vsub.f32 2.0, %v273_v0 }
  0x6f   : > { %v275_v3 = vmul.f32 %v544_v62, %v274_v2 }
  0x71   : > { %v276_v4 = vmul.f32 %v275_v3, %v271_v1 }
  0x73   : > { %v278_v5 = vsel %vm234_vm0, %v276_v4, 0.0 }
  0x74   : > { %v279_v6 = vrot.slane %v278_v5, 4 }
  0x76   : > { %v280_v7 = vadd.f32 %v279_v6, %v278_v5 }
  0x78   : > { %v281_v8 = vrot.slane %v280_v7, 2 }
  0x7a   : > { %v282_v9 = vadd.f32 %v281_v8, %v280_v7 }
  0x7c   : > { %v283_v11 = vrot.slane %v282_v9, 1 }
  0x7e   : > { %v284_v10 = vadd.f32 %v283_v11, %v282_v9 }
  0x80   : > { %v285_v13 = vadd.f32 %v284_v10, %v277_v12 }
  0x82   : > { %286 = vst [vmem:[#allocation2] sm:$0x1] %v285_v13 }
  0x89   : > { %v307_v14 = vld [vmem:[#allocation2] sm:$0x1] }
  0x8a   : > { %v309_v15 = vsel %vm308_vm1, %v307_v14, 0.0 }
  0x8b   : > { %310 = vadd.xlane.f32.xlu0 %v309_v15 }
  0xe7   : > { %v315_v16 = vpop.xlane.xlu0 %314 }
  0xe8   : > { %v316_v17 = vadd.f32 256.0, %v315_v16 }
 0x114   : > { %v311_v18 = vpop.xlane.xlu0 %310 }
 0x115   : > { %v317_v19 = vsub.f32 %v316_v17, %v311_v18 }
 0x117   : > { %545 = vrcp.f32 %v317_v19 }
 0x124   : > { %v546_v22 = vpop.eup %545 }
 0x125   : > { %v319_v24 = vmul.f32 %v546_v22, %v311_v18 }
 0x127   : > { %v320_v25 = vsub.f32 1.0, %v319_v24 }
 0x129   : > { %v324_v26 = vrot.slane %v320_v25, %v323_v23 }
 0x12b   : > { %325 = vst [vmem:[%s219_s19] sm:$0xff] %v324_v26 }
 0x12c   : > { %616 = shalt.err (!%p613_p7)
}
 0x12d   : > { %s617_s4 = scalar_lea.hbm %s338_s7, 128  ;;  %s621_s26 = scalar_lea.hbm %s904_s2, 256 }
 0x12e   : > { %p618_p10 = scmp.ne.s32.totalorder %s338_s7, %s617_s4  ;;  %p622_p3 = scmp.lt.s32.totalorder %s338_s7, %s904_s2 }
 0x12f   : > { %p623_p8 = scmp.lt.s32.totalorder %s621_s26, %s617_s4 }
 0x130   : > { %p619_p1 = pnand %p618_p10, %p761_p9 }
 0x131   : > { %p624_p0 = por %p623_p8, %p622_p3 }
 0x132   : > { %p620_p13 = pneg %p619_p1 }
 0x134   : > { %p625_p12 = pnand %p624_p0, %p620_p13 }
 0x136   : > { %628 = shalt.err (!%p625_p12)
}
 0x137   : > { %469 = dma.vmem_to_hbm [thread:$0]  (%p761_p9), %s341_s28, 128, %s338_s7, %s327_s8  }
 0x138 PF: > { %s352_s5 = sand.u32 1, %s667_s9   ;;  %p911_p2 = scmp.ge.s32.totalorder %s687_s14, 2 }
 0x139   : > { %s353_s18 = scalar_lea.sflag [#allocation6], %s352_s5 }
 0x13a   : > { %p479_p5 = pnand %p911_p2, %p768_p11 }
 0x13c   : > { %p480_p6 = pneg %p479_p5 }
 0x13e   : > { %662 = dma.done.wait (%p480_p6), %s353_s18, 128  }
 0x13f   : > { %664 = vsyncadd (%p480_p6), %s353_s18, 4294967168  ;;  %s21_s14 = sadd.s32 1, %s687_s14   ;;  %s912_s9 = smov %s671_s10 }
 0x140   : > { %p18_p4 = scmp.ge.s32.totalorder %s21_s14, 4   ;;  %s913_s10 = smov %s675_s11 }
 0x141   : > { %s914_s11 = smov %s766_s23  ;;  %s915_s12 = smov %s683_s13 }
 0x142   : > { %s916_s13 = smov %s918_s17  ;;  %20 = sbr.rel (!%p18_p4) target bundleno = 8 (0x8), region = 94 }
 0x147   :  { %358 = vsyncpa [#allocation5], 1 }
 0x148   :  { %360 = vsyncpa [#allocation5 + $0x1], 1 }
 0x149   :  { %361 = vsyncpa [#allocation8], 1 }
 0x14a   :  { %363 = vsyncpa [#allocation8 + $0x1], 1 }
 0x14b   :  { %364 = vsyncpa [#allocation6], 1 }
 0x14c   :  { %366 = vsyncpa [#allocation6 + $0x1], 1 }

</bundles_post_ra>
